<compile_context>
chip_gen: v6e
topology: v6e:2x2x1
jax: 0.10.0
libtpu: 0.0.40
codegen_flags: <defaults>
</compile_context>

<pallas_src>
import functools
from typing import NamedTuple

import jax
import jax.numpy as jnp
from jax.experimental import pallas as pl
from jax.experimental.pallas import tpu as pltpu


# --------------------------------------------------------------------------- #
# Packed-parameter layout: row offsets into one (n_rows, LW) f32 VMEM slab.
# --------------------------------------------------------------------------- #
class _Layout(NamedTuple):
    S_p: int      # state dim padded to a sublane multiple (8)
    LW: int       # lane width = round_up(K*H, 128)
    r_w1: int     # (S_p, LW)   rows   [r_w1, r_w1+S_p)
    r_b1: int     # (1, LW)     row    r_b1
    r_w2: int     # (LW, LW)    rows   [r_w2, r_w2+LW)   block-diagonal
    r_b2: int     # (1, LW)     row    r_b2
    r_w3: int     # (LW, LW)    rows   [r_w3, r_w3+LW)   block-diagonal
    r_b3: int     # (1, LW)     row    r_b3
    n_rows: int


def _round_up(x: int, m: int) -> int:
    return (x + m - 1) // m * m


def _layout(K: int, S: int, H: int, A: int) -> _Layout:
    KH, KA = K * H, K * A
    LW = _round_up(KH, 128)
    assert KA <= LW, "K*A must fit in the packed lane width"
    S_p = _round_up(S, 8)
    r_w1 = 0
    r_b1 = r_w1 + S_p
    r_w2 = r_b1 + 8
    r_b2 = r_w2 + LW
    r_w3 = r_b2 + 8
    r_b3 = r_w3 + LW
    return _Layout(S_p, LW, r_w1, r_b1, r_w2, r_b2, r_w3, r_b3, r_b3 + 8)


# --------------------------------------------------------------------------- #
# Kernel: one invocation, 2 input DMAs, 3 dense MXU matmuls, VPU mean, 1 store.
# --------------------------------------------------------------------------- #
def _ensemble_kernel(x_ref, p_ref, o_ref, *, lay: _Layout, K: int, A: int):
    x = x_ref[...]                                               # (BP, S_p)

    # layer 1: (BP, S_p) @ (S_p, LW) -> (BP, LW), ReLU
    w1 = p_ref[lay.r_w1:lay.r_w1 + lay.S_p, :]
    b1 = p_ref[lay.r_b1:lay.r_b1 + 1, :]
    h1 = jnp.maximum(jnp.dot(x, w1, preferred_element_type=jnp.float32) + b1, 0.0)

    # layer 2: block-diagonal (LW, LW) keeps the K members independent
    w2 = p_ref[lay.r_w2:lay.r_w2 + lay.LW, :]
    b2 = p_ref[lay.r_b2:lay.r_b2 + 1, :]
    h2 = jnp.maximum(jnp.dot(h1, w2, preferred_element_type=jnp.float32) + b2, 0.0)

    # head: block-diagonal (LW, LW), per-member Softplus BEFORE the mean
    w3 = p_ref[lay.r_w3:lay.r_w3 + lay.LW, :]
    b3 = p_ref[lay.r_b3:lay.r_b3 + 1, :]
    a = jax.nn.softplus(jnp.dot(h2, w3, preferred_element_type=jnp.float32) + b3)

    # ensemble mean over the K member blocks (each A lanes wide): K-1 VPU adds
    acc = a[:, 0:A]
    for k in range(1, K):                       # static, tiny (trace-time loop)
        acc = acc + a[:, k * A:(k + 1) * A]
    o_ref[...] = acc * (1.0 / K)                                  # (BP, A)


# --------------------------------------------------------------------------- #
# One-time parameter packing (runs ONCE when ensemble weights are set).
# --------------------------------------------------------------------------- #
def _block_diag(blocks):
    """(K, n, m) -> (K*n, K*m) block diagonal (static K; pack-time only)."""
    K, n, m = blocks.shape
    out = jnp.zeros((K * n, K * m), blocks.dtype)
    for k in range(K):
        out = out.at[k * n:(k + 1) * n, k * m:(k + 1) * m].set(blocks[k])
    return out


def pack_ensemble_params(w1, b1, w2, b2, w3, b3):
    """
    Pack all ensemble parameters into one row/lane-aligned f32 slab.

    Per-member weights are stored (in, out), i.e. transposed vs torch Linear.
    Zero padding of the unused lanes/rows is load-bearing: padded hidden units
    stay exactly zero through ReLU and contribute nothing downstream.
    """
    K, S, H = w1.shape
    A = w3.shape[-1]
    KH, KA = K * H, K * A
    lay = _layout(K, S, H, A)

    buf = jnp.zeros((lay.n_rows, lay.LW), jnp.float32)
    w1p = jnp.transpose(w1, (1, 0, 2)).reshape(S, KH)            # member-major lanes
    buf = buf.at[lay.r_w1:lay.r_w1 + S, :KH].set(w1p.astype(jnp.float32))
    buf = buf.at[lay.r_b1, :KH].set(b1.reshape(KH).astype(jnp.float32))
    buf = buf.at[lay.r_w2:lay.r_w2 + KH, :KH].set(_block_diag(w2).astype(jnp.float32))
    buf = buf.at[lay.r_b2, :KH].set(b2.reshape(KH).astype(jnp.float32))
    buf = buf.at[lay.r_w3:lay.r_w3 + KH, :KA].set(_block_diag(w3).astype(jnp.float32))
    buf = buf.at[lay.r_b3, :KA].set(b3.reshape(KA).astype(jnp.float32))
    return buf


# --------------------------------------------------------------------------- #
# Forward builder: jitted wrapper -> single grid-less pallas_call (2 inputs).
# --------------------------------------------------------------------------- #
def make_ensemble_forward(K: int, S: int, H: int, A: int):
    lay = _layout(K, S, H, A)
    kernel = functools.partial(_ensemble_kernel, lay=lay, K=K, A=A)
    vmem = pl.BlockSpec(memory_space=pltpu.MemorySpace.VMEM)

    @jax.jit
    def forward(x, packed_params):
        B = x.shape[0]
        BP = _round_up(max(B, 8), 8)            # full-sublane activations
        x_p = jnp.zeros((BP, lay.S_p), jnp.float32).at[:B, :S].set(x)

        cost = pl.CostEstimate(
            flops=2 * BP * lay.LW * (lay.S_p + 2 * lay.LW),
            transcendentals=2 * BP * lay.LW,
            bytes_accessed=4 * (BP * lay.S_p + lay.n_rows * lay.LW + BP * A),
        )
        out_p = pl.pallas_call(
            kernel,
            out_shape=jax.ShapeDtypeStruct((BP, A), jnp.float32),
            in_specs=[vmem, vmem],
            out_specs=vmem,
            cost_estimate=cost,
        )(x_p, packed_params)
        return out_p[:B]                        # drop batch padding

    return forward


# --------------------------------------------------------------------------- #
# Pure-JAX reference (torch semantics: per-member forward, then mean(dim=0)).
# --------------------------------------------------------------------------- #
def _reference(x, w1, b1, w2, b2, w3, b3):
    def one(wa, ba, wb, bb, wc, bc):
        h1 = jnp.maximum(x @ wa + ba[0], 0.0)
        h2 = jnp.maximum(h1 @ wb + bb[0], 0.0)
        return jax.nn.softplus(h2 @ wc + bc[0])
    acts = jax.vmap(one)(w1, b1, w2, b2, w3, b3)   # (K, B, A) == torch.stack
    return acts.mean(axis=0)                        # .mean(dim=0)


if __name__ == "__main__":
    # small, deterministic shapes (K*H = 128 exactly fills the lane axis)
    K = 4          # ensemble size (top-k models)
    B = 2          # batch of states
    S = 8          # state dim
    H = 32         # hidden dim
    A = 4          # action dim

    key = jax.random.PRNGKey(0)
    ks = jax.random.split(key, 7)

    x = jax.random.normal(ks[0], (B, S), dtype=jnp.float32)
    w1 = 0.2 * jax.random.normal(ks[1], (K, S, H), dtype=jnp.float32)
    b1 = 0.1 * jax.random.normal(ks[2], (K, 1, H), dtype=jnp.float32)
    w2 = 0.2 * jax.random.normal(ks[3], (K, H, H), dtype=jnp.float32)
    b2 = 0.1 * jax.random.normal(ks[4], (K, 1, H), dtype=jnp.float32)
    w3 = 0.2 * jax.random.normal(ks[5], (K, H, A), dtype=jnp.float32)
    b3 = 0.1 * jax.random.normal(ks[6], (K, 1, A), dtype=jnp.float32)

    # one-time packing (outside the per-call path), then the jitted forward
    packed = jax.block_until_ready(pack_ensemble_params(w1, b1, w2, b2, w3, b3))
    forward = make_ensemble_forward(K, S, H, A)

    out = jax.block_until_ready(forward(x, packed))

    ref = _reference(x, w1, b1, w2, b2, w3, b3)
    assert out.shape == (B, A)
    assert jnp.allclose(out, ref, atol=1e-5, rtol=1e-5), (out, ref)

    print("KERNEL_OK")
</pallas_src>

<mosaic_0001>
module attributes {stable_mosaic.version = 11 : i64} {
  func.func @_ensemble_kernel(%arg0: memref<8x8xf32, #tpu.memory_space<vmem>>, %arg1: memref<288x128xf32, #tpu.memory_space<vmem>>, %arg2: memref<8x4xf32, #tpu.memory_space<vmem>>) attributes {dimension_semantics = [], scalar_prefetch = 0 : i64, scratch_operands = 0 : i64, tpu.core_type = #tpu.core_type<tc>} {
    %c0 = arith.constant 0 : index
    %c0_0 = arith.constant 0 : index
    %0 = vector.load %arg0[%c0, %c0_0] : memref<8x8xf32, #tpu.memory_space<vmem>>, vector<8x8xf32>
    %c0_1 = arith.constant 0 : index
    %c0_2 = arith.constant 0 : index
    %1 = vector.load %arg1[%c0_1, %c0_2] : memref<288x128xf32, #tpu.memory_space<vmem>>, vector<8x128xf32>
    %c8 = arith.constant 8 : index
    %c0_3 = arith.constant 0 : index
    %2 = vector.load %arg1[%c8, %c0_3] : memref<288x128xf32, #tpu.memory_space<vmem>>, vector<1x128xf32>
    %cst = arith.constant dense<0.000000e+00> : vector<8x128xf32>
    %3 = tpu.matmul %0, %1, %cst {dimension_numbers = #tpu.dot_dimension_numbers<[1], [0], [0], [1], [0, 0, 1, 1], [], []>} : vector<8x8xf32>, vector<8x128xf32>, vector<8x128xf32> -> vector<8x128xf32>
    %4 = vector.broadcast %2 : vector<1x128xf32> to vector<8x128xf32>
    %5 = arith.addf %3, %4 : vector<8x128xf32>
    %cst_4 = arith.constant 0.000000e+00 : f32
    %6 = vector.broadcast %cst_4 : f32 to vector<8x128xf32>
    %7 = arith.maximumf %5, %6 : vector<8x128xf32>
    %c16 = arith.constant 16 : index
    %c0_5 = arith.constant 0 : index
    %8 = vector.load %arg1[%c16, %c0_5] : memref<288x128xf32, #tpu.memory_space<vmem>>, vector<128x128xf32>
    %c144 = arith.constant 144 : index
    %c0_6 = arith.constant 0 : index
    %9 = vector.load %arg1[%c144, %c0_6] : memref<288x128xf32, #tpu.memory_space<vmem>>, vector<1x128xf32>
    %cst_7 = arith.constant dense<0.000000e+00> : vector<8x128xf32>
    %10 = tpu.matmul %7, %8, %cst_7 {dimension_numbers = #tpu.dot_dimension_numbers<[1], [0], [0], [1], [0, 0, 1, 1], [], []>} : vector<8x128xf32>, vector<128x128xf32>, vector<8x128xf32> -> vector<8x128xf32>
    %11 = vector.broadcast %9 : vector<1x128xf32> to vector<8x128xf32>
    %12 = arith.addf %10, %11 : vector<8x128xf32>
    %cst_8 = arith.constant 0.000000e+00 : f32
    %13 = vector.broadcast %cst_8 : f32 to vector<8x128xf32>
    %14 = arith.maximumf %12, %13 : vector<8x128xf32>
    %c152 = arith.constant 152 : index
    %c0_9 = arith.constant 0 : index
    %15 = vector.load %arg1[%c152, %c0_9] : memref<288x128xf32, #tpu.memory_space<vmem>>, vector<128x128xf32>
    %c280 = arith.constant 280 : index
    %c0_10 = arith.constant 0 : index
    %16 = vector.load %arg1[%c280, %c0_10] : memref<288x128xf32, #tpu.memory_space<vmem>>, vector<1x128xf32>
    %cst_11 = arith.constant dense<0.000000e+00> : vector<8x128xf32>
    %17 = tpu.matmul %14, %15, %cst_11 {dimension_numbers = #tpu.dot_dimension_numbers<[1], [0], [0], [1], [0, 0, 1, 1], [], []>} : vector<8x128xf32>, vector<128x128xf32>, vector<8x128xf32> -> vector<8x128xf32>
    %18 = vector.broadcast %16 : vector<1x128xf32> to vector<8x128xf32>
    %19 = arith.addf %17, %18 : vector<8x128xf32>
    %cst_12 = arith.constant 0.000000e+00 : f32
    %20 = vector.broadcast %cst_12 : f32 to vector<8x128xf32>
    %21 = arith.maximumf %19, %20 : vector<8x128xf32>
    %22 = vector.broadcast %cst_12 : f32 to vector<8x128xf32>
    %23 = arith.subf %19, %22 : vector<8x128xf32>
    %24 = arith.cmpf one, %23, %23 : vector<8x128xf32>
    %25 = vector.broadcast %cst_12 : f32 to vector<8x128xf32>
    %26 = arith.addf %19, %25 : vector<8x128xf32>
    %27 = math.absf %23 : vector<8x128xf32>
    %cst_13 = arith.constant 0.000000e+00 : f32
    %28 = vector.broadcast %cst_13 : f32 to vector<8x128xf32>
    %29 = arith.subf %28, %27 : vector<8x128xf32>
    %30 = math.exp %29 : vector<8x128xf32>
    %31 = math.log1p %30 : vector<8x128xf32>
    %32 = arith.addf %21, %31 : vector<8x128xf32>
    %33 = arith.select %24, %26, %32 : vector<8x128xi1>, vector<8x128xf32>
    %34 = vector.extract_strided_slice %33 {offsets = [0, 0], sizes = [8, 4], strides = [1, 1]} : vector<8x128xf32> to vector<8x4xf32>
    %35 = vector.extract_strided_slice %33 {offsets = [0, 4], sizes = [8, 4], strides = [1, 1]} : vector<8x128xf32> to vector<8x4xf32>
    %36 = arith.addf %34, %35 : vector<8x4xf32>
    %37 = vector.extract_strided_slice %33 {offsets = [0, 8], sizes = [8, 4], strides = [1, 1]} : vector<8x128xf32> to vector<8x4xf32>
    %38 = arith.addf %36, %37 : vector<8x4xf32>
    %39 = vector.extract_strided_slice %33 {offsets = [0, 12], sizes = [8, 4], strides = [1, 1]} : vector<8x128xf32> to vector<8x4xf32>
    %40 = arith.addf %38, %39 : vector<8x4xf32>
    %cst_14 = arith.constant 2.500000e-01 : f32
    %41 = vector.broadcast %cst_14 : f32 to vector<8x4xf32>
    %42 = arith.mulf %40, %41 : vector<8x4xf32>
    %c0_15 = arith.constant 0 : index
    %c0_16 = arith.constant 0 : index
    %43 = vector.load %arg2[%c0_15, %c0_16] : memref<8x4xf32, #tpu.memory_space<vmem>>, vector<8x4xf32>
    tpu.vector_store %arg2[%c0_15, %c0_16], %42 {strides = array<i32>} : memref<8x4xf32, #tpu.memory_space<vmem>>, vector<8x4xf32>,
    return
  }
}

</mosaic_0001>

<bundles_post_ra>
// kernel: forward.1
= control target key start
LH: loop header
LB: loop body
LE: loop exit
PB: predicated region body
PF: predicated region fallthrough
CT: control target
= control target key end

     0   :  { %7 = vsyncpa [#allocation3], 0  ;;  %s478_s9 = smov [#allocation2]   ;;  %s549_s0 = inlined_call_operand.vmem [shape: f32[8,8], index: 0, kind: input, shape index: {}]   ;;  %s550_s1 = inlined_call_operand.hbm [shape: f32[288,128], index: 1, kind: input, shape index: {}]   ;;  %s551_s2 = inlined_call_operand.vmem [shape: f32[8,4], index: 2, kind: output, shape index: {}]  }
   0x1   :  { %s15_s10 = sshll.u32 %s478_s9, 4  ;;  %s16_s10 = int_to_ptr.vmem [resolvable:$true] %s15_s10 }
   0x2   :  { %s464_s11 = scalar_lea.vmem %s16_s10, 4608  ;;  %p469_p1 = scmp.lt.s32.totalorder %s16_s10, %s16_s10 }
   0x3   :  { %p465_p0 = scmp.ne.s32.totalorder %s16_s10, %s464_s11  ;;  %p470_p2 = scmp.lt.s32.totalorder %s464_s11, %s464_s11 }
   0x5   :  { %p471_p3 = por %p470_p2, %p469_p1 }
   0x7   :  { %p472_p4 = pnand %p471_p3, %p465_p0 }
   0x9   :  { %475 = shalt.err (!%p472_p4)
}
   0xa   :  { %s479_s12 = smov 128   ;;  %s480_s13 = smov 8  }
   0xb   :  { %21 = dma.hbm_to_vmem [thread:$0]  %s550_s1, 4608, %s16_s10, [#allocation3], %s479_s12, %s479_s12, %s480_s13  }
   0xc   :  { %476 = dma.done.wait [#allocation3], 4608  }
   0xd   :  { %477 = vsyncadd [#allocation3], 4294962688  ;;  %v481_v0 = vmov 0.0   ;;  %vm482_vm0 = vmmov 0   ;;  %vm32_vm1 = vcmask 64512   ;;  %v26_v1 = vld [vmem:[#allocation2] sm:$0xff] }
   0xe   :  { %369 = vmatprep.subr.mxu0 %v481_v0  ;;  %371 = vmatprep.mubr.msk.f32.mxu0 %vm482_vm0, %v481_v0  ;;  %v25_v2 = vld [vmem:[%s549_s0] sm:$0xff]  ;;  %v122_v3 = vld [vmem:[#allocation2 + $0x88] sm:$0xff]  ;;  %v120_v5 = vld [vmem:[#allocation2 + $0x78] sm:$0xff]  ;;  %s483_s0 = smov 116   ;;  %s484_s1 = smov 124   ;;  %vm322_vm4 = vcmask 31744  }
   0xf   :  { %374 = vmatprep.subr.mxu1 %v481_v0  ;;  %406 = vmatprep.mubr.msk.f32.mxu1 %vm482_vm0, %v481_v0  ;;  %v121_v4 = vld [vmem:[#allocation2 + $0x80] sm:$0xff]  ;;  %v119_v6 = vld [vmem:[#allocation2 + $0x70] sm:$0xff]  ;;  %v118_v7 = vld [vmem:[#allocation2 + $0x68] sm:$0xff]  ;;  %s485_s18 = smov 120  }
  0x10   :  { %370 = vmatpush3.msra.mxu0 %v26_v1  ;;  %375 = vmatpush3.msra.mxu1 %v122_v3  ;;  %v117_v8 = vld [vmem:[#allocation2 + $0x60] sm:$0xff]  ;;  %v116_v9 = vld [vmem:[#allocation2 + $0x58] sm:$0xff]  ;;  %v115_v10 = vld [vmem:[#allocation2 + $0x50] sm:$0xff] }
  0x11   :  { %372 = vmatmul.mubr.msk.f32.vlgmr.msra.gmra.mxu0 %vm32_vm1, %v25_v2  ;;  %376 = vmatprep.subr.mxu1 %v481_v0  ;;  %v114_v11 = vld [vmem:[#allocation2 + $0x48] sm:$0xff]  ;;  %v113_v12 = vld [vmem:[#allocation2 + $0x40] sm:$0xff]  ;;  %v112_v13 = vld [vmem:[#allocation2 + $0x38] sm:$0xff] }
  0x12   :  { %377 = vmatpush3.msra.mxu1 %v121_v4  ;;  %409 = vmatprep.subr.mxu0 %v481_v0  ;;  %v111_v14 = vld [vmem:[#allocation2 + $0x30] sm:$0xff]  ;;  %v110_v15 = vld [vmem:[#allocation2 + $0x28] sm:$0xff]  ;;  %v109_v16 = vld [vmem:[#allocation2 + $0x20] sm:$0xff] }
  0x13   :  { %378 = vmatprep.subr.mxu1 %v481_v0  ;;  %441 = vmatprep.mubr.msk.f32.mxu0 %vm482_vm0, %v481_v0  ;;  %v108_v17 = vld [vmem:[#allocation2 + $0x18] sm:$0xff]  ;;  %v107_v18 = vld [vmem:[#allocation2 + $0x10] sm:$0xff]  ;;  %v213_v20 = vld [vmem:[#allocation2 + $0x108] sm:$0xff] }
  0x14   :  { %379 = vmatpush3.msra.mxu1 %v120_v5  ;;  %v214_v19 = vld [vmem:[#allocation2 + $0x110] sm:$0xff]  ;;  %v212_v21 = vld [vmem:[#allocation2 + $0x100] sm:$0xff]  ;;  %v211_v22 = vld [vmem:[#allocation2 + $0xf8] sm:$0xff] }
  0x15   :  { %380 = vmatprep.subr.mxu1 %v481_v0  ;;  %410 = vmatpush3.msra.mxu0 %v214_v19  ;;  %v210_v23 = vld [vmem:[#allocation2 + $0xf0] sm:$0xff]  ;;  %v209_v24 = vld [vmem:[#allocation2 + $0xe8] sm:$0xff]  ;;  %v208_v25 = vld [vmem:[#allocation2 + $0xe0] sm:$0xff] }
  0x16   :  { %381 = vmatpush3.msra.mxu1 %v119_v6  ;;  %411 = vmatprep.subr.mxu0 %v481_v0  ;;  %v207_v26 = vld [vmem:[#allocation2 + $0xd8] sm:$0xff]  ;;  %v206_v27 = vld [vmem:[#allocation2 + $0xd0] sm:$0xff]  ;;  %v205_v28 = vld [vmem:[#allocation2 + $0xc8] sm:$0xff] }
  0x17   :  { %382 = vmatprep.subr.mxu1 %v481_v0  ;;  %412 = vmatpush3.msra.mxu0 %v213_v20  ;;  %v204_v29 = vld [vmem:[#allocation2 + $0xc0] sm:$0xff]  ;;  %v203_v30 = vld [vmem:[#allocation2 + $0xb8] sm:$0xff]  ;;  %v202_v31 = vld [vmem:[#allocation2 + $0xb0] sm:$0xff] }
  0x18   :  { %383 = vmatpush3.msra.mxu1 %v118_v7  ;;  %413 = vmatprep.subr.mxu0 %v481_v0  ;;  %v329_v32 = vld [vmem:[#allocation2 + $0x8] ss:$0 sm:$0xff]  ;;  %v200_v38 = vld [vmem:[#allocation2 + $0xa0] sm:$0xff]  ;;  %v199_v39 = vld [vmem:[#allocation2 + $0x98] sm:$0xff] }
  0x19   :  { %384 = vmatprep.subr.mxu1 %v481_v0  ;;  %414 = vmatpush3.msra.mxu0 %v212_v21  ;;  %v201_v37 = vld [vmem:[#allocation2 + $0xa8] sm:$0xff]  ;;  %v331_v40 = vld [vmem:[#allocation2 + $0x90] ss:$0 sm:$0xff]  ;;  %v332_v45 = vld [vmem:[#allocation2 + $0x118] ss:$0 sm:$0xff] }
  0x1a   :  { %385 = vmatpush3.msra.mxu1 %v117_v8  ;;  %415 = vmatprep.subr.mxu0 %v481_v0 }
  0x1b   :  { %386 = vmatprep.subr.mxu1 %v481_v0  ;;  %416 = vmatpush3.msra.mxu0 %v211_v22 }
  0x1c   :  { %387 = vmatpush3.msra.mxu1 %v116_v9  ;;  %417 = vmatprep.subr.mxu0 %v481_v0 }
  0x1d   :  { %388 = vmatprep.subr.mxu1 %v481_v0  ;;  %418 = vmatpush3.msra.mxu0 %v210_v23 }
  0x1e   :  { %389 = vmatpush3.msra.mxu1 %v115_v10  ;;  %419 = vmatprep.subr.mxu0 %v481_v0 }
  0x1f   :  { %390 = vmatprep.subr.mxu1 %v481_v0  ;;  %420 = vmatpush3.msra.mxu0 %v209_v24 }
  0x20   :  { %391 = vmatpush3.msra.mxu1 %v114_v11  ;;  %421 = vmatprep.subr.mxu0 %v481_v0 }
  0x21   :  { %392 = vmatprep.subr.mxu1 %v481_v0  ;;  %422 = vmatpush3.msra.mxu0 %v208_v25 }
  0x22   :  { %393 = vmatpush3.msra.mxu1 %v113_v12  ;;  %423 = vmatprep.subr.mxu0 %v481_v0 }
  0x23   :  { %394 = vmatprep.subr.mxu1 %v481_v0  ;;  %424 = vmatpush3.msra.mxu0 %v207_v26 }
  0x24   :  { %395 = vmatpush3.msra.mxu1 %v112_v13  ;;  %425 = vmatprep.subr.mxu0 %v481_v0 }
  0x25   :  { %396 = vmatprep.subr.mxu1 %v481_v0  ;;  %426 = vmatpush3.msra.mxu0 %v206_v27 }
  0x26   :  { %397 = vmatpush3.msra.mxu1 %v111_v14  ;;  %427 = vmatprep.subr.mxu0 %v481_v0 }
  0x27   :  { %398 = vmatprep.subr.mxu1 %v481_v0  ;;  %428 = vmatpush3.msra.mxu0 %v205_v28 }
  0x28   :  { %399 = vmatpush3.msra.mxu1 %v110_v15  ;;  %429 = vmatprep.subr.mxu0 %v481_v0 }
  0x29   :  { %400 = vmatprep.subr.mxu1 %v481_v0  ;;  %430 = vmatpush3.msra.mxu0 %v204_v29 }
  0x2a   :  { %401 = vmatpush3.msra.mxu1 %v109_v16  ;;  %431 = vmatprep.subr.mxu0 %v481_v0 }
  0x2b   :  { %402 = vmatprep.subr.mxu1 %v481_v0  ;;  %432 = vmatpush3.msra.mxu0 %v203_v30 }
  0x2c   :  { %403 = vmatpush3.msra.mxu1 %v108_v17  ;;  %433 = vmatprep.subr.mxu0 %v481_v0 }
  0x2d   :  { %404 = vmatprep.subr.mxu1 %v481_v0  ;;  %434 = vmatpush3.msra.mxu0 %v202_v31 }
  0x2e   :  { %405 = vmatpush3.msra.mxu1 %v107_v18  ;;  %435 = vmatprep.subr.mxu0 %v481_v0 }
  0x2f   :  { %436 = vmatpush3.msra.mxu0 %v201_v37 }
  0x30   :  { %437 = vmatprep.subr.mxu0 %v481_v0 }
  0x31   :  { %438 = vmatpush3.msra.mxu0 %v200_v38 }
  0x32   :  { %439 = vmatprep.subr.mxu0 %v481_v0 }
  0x33   :  { %440 = vmatpush3.msra.mxu0 %v199_v39 }
  0xd1   :  { %v102_v33 = vpop.f32.mrf.mxu0 }
  0xd2   :  { %v103_v34 = vadd.f32 %v329_v32, %v102_v33 }
  0xd3   :  { %v373_v35 = vpop.f32.mrf.mxu0 }
  0xd4   :  { %v106_v36 = vmax.f32 %v103_v34, 0.0 }
  0xd6   :  { %407 = vmatmul.mubr.f32.vlgmr.msra.gmra.mxu1 %v106_v36 }
 0x196   :  { %v194_v41 = vpop.f32.mrf.mxu1 }
 0x197   :  { %v195_v42 = vadd.f32 %v331_v40, %v194_v41 }
 0x198   :  { %v408_v43 = vpop.f32.mrf.mxu1 }
 0x199   :  { %v198_v44 = vmax.f32 %v195_v42, 0.0 }
 0x19b   :  { %442 = vmatmul.mubr.f32.vlgmr.msra.gmra.mxu0 %v198_v44 }
 0x25b   :  { %v286_v46 = vpop.f32.mrf.mxu0 }
 0x25c   :  { %v287_v47 = vadd.f32 %v332_v45, %v286_v46 }
 0x25d   :  { %v443_v48 = vpop.f32.mrf.mxu0 }
 0x25e   :  { %v293_v49 = vand.u32 2147483647, %v287_v47  ;;  %v290_v60 = vmax.f32 %v287_v47, 0.0  ;;  %vm291_vm3 = vcmp.ne.f32.partialorder %v287_v47, %v287_v47 }
 0x260   :  { %v294_v50 = vsub.f32 0.0, %v293_v49 }
 0x262   :  { %v295_v51 = vmul.f32 1.442695, %v294_v50 }
 0x264   :  { %452 = vpow2.f32 %v295_v51 }
 0x271   :  { %v453_v52 = vpop.eup %452 }
 0x272   :  { %v297_v53 = vadd.f32 1.0, %v453_v52  ;;  %v300_v54 = vmul.f32 -0.5, %v453_v52  ;;  %v303_v56 = vand.u32 2147483647, %v453_v52 }
 0x274   :  { %454 = vlog2.f32 %v297_v53  ;;  %v301_v55 = vadd.f32 1.0, %v300_v54  ;;  %vm304_vm2 = vcmp.lt.f32.partialorder %v303_v56, 0.0004427343 }
 0x276   :  { %v302_v59 = vmul.f32 %v453_v52, %v301_v55 }
 0x281   :  { %v455_v57 = vpop.eup %454 }
 0x282   :  { %v299_v58 = vmul.f32 0.6931472, %v455_v57 }
 0x284   :  { %v305_v61 = vsel %vm304_vm2, %v302_v59, %v299_v58 }
 0x285   :  { %v306_v62 = vadd.f32 %v305_v61, %v290_v60 }
 0x287   :  { %v307_v63 = vsel %vm291_vm3, %v287_v47, %v306_v62 }
 0x288   :  { %317 = vrot.lane.b32.xlu1 %v307_v63, %s483_s0  ;;  %309 = vrot.lane.b32.xlu0 %v307_v63, %s484_s1 }
 0x28c   :  { %313 = vrot.lane.b32.xlu0 %v307_v63, %s485_s18 }
 0x2fa   :  { %v310_v0 = vpop.permute.xlu0 %309  ;;  %v318_v4 = vpop.permute.xlu1 %317 }
 0x2fb   :  { %v312_v1 = vadd.f32 %v310_v0, %v307_v63 }
 0x2fe   :  { %v314_v2 = vpop.permute.xlu0 %313 }
 0x2ff   :  { %v316_v3 = vadd.f32 %v314_v2, %v312_v1 }
 0x301   :  { %v320_v5 = vadd.f32 %v318_v4, %v316_v3 }
 0x303   :  { %v321_v6 = vmul.f32 0.25, %v320_v5 }
 0x305   :  { %323 = vst.msk [vmem:[%s551_s2] sm:$0xff] %vm322_vm4, %v321_v6 }
 0x306   :  { %328 = vsyncpa [#allocation3], 1 }

</bundles_post_ra>
